<compile_context>
chip_gen: v6e
topology: v6e:2x2x1
jax: 0.10.0
libtpu: 0.0.40
codegen_flags: <defaults>
</compile_context>

<pallas_src>
import functools

import jax
import jax.numpy as jnp
from jax.experimental import pallas as pl
from jax.experimental.pallas import tpu as pltpu


def _vmem_capacity_bytes():
    try:
        return int(pltpu.get_tpu_info().vmem_capacity_bytes)
    except Exception:
        return 64 * 1024 * 1024  # conservative (v7x per-TC)


def _dual_tensorcore():
    try:
        kind = jax.devices()[0].device_kind.lower()
        return ("v7" in kind) or ("v4" in kind)
    except Exception:
        return False


def _pick_tile_n(hw_pad, ch):
    """Output-pixel tile width: lane-dense, divides padded HW, bounded temporaries."""
    # Cap so the f32 (CH, TN) MXU result stays a few MiB at most.
    cap = max(128, ((4 << 20) // max(ch * 4, 1)) // 128 * 128)
    for tn in (2048, 1024, 512, 384, 256, 128):
        if tn <= cap and hw_pad % tn == 0:
            return tn
    return 128


def _pick_batch_block(n, c, h, w, tn, vmem_cap, dual_tc):
    """Images per grid step, bounded by VMEM and (on dual-TC chips) >=2 nb points."""
    ch = c * h
    # Per extra image: x block (f32, double-buffered) + bf16 scratch + out rows.
    per_img = 2 * ch * w * 4 + ch * w * 2 + 2 * c * tn * 4
    budget = max(per_img, int(vmem_cap * 0.6) - (4 << 20))
    bn = max(1, min(8, n, budget // per_img))
    if dual_tc:
        bn = min(bn, max(1, n // 2))  # keep both TensorCores busy on the nb axis
    while n % bn:
        bn -= 1
    return max(1, bn)


def _eot_kernel(contrast_ref, brightness_ref, theta_ref, base_ref,
                x_ref, o_ref, y_ref, *, H, W, C, BN):
    nb = pl.program_id(0)
    j = pl.program_id(1)

    # ---- j-invariant: photometric transform + bf16 pack, once per batch block.
    @pl.when(j == 0)
    def _():
        for b in range(BN):                       # static, BN <= 8
            n = nb * BN + b
            con = contrast_ref[n]
            bri = brightness_ref[n]
            y_ref[b] = jnp.clip(x_ref[b] * con + bri, 0.0, 1.0).astype(jnp.bfloat16)

    base = base_ref[...]                          # (2, TN) f32
    xb = base[0:1, :]                             # normalized base x
    yb = base[1:2, :]                             # normalized base y

    # Input row / column coordinates (theta-independent, tiny).
    in_x = jax.lax.broadcasted_iota(jnp.int32, (W, 1), 0).astype(jnp.float32)
    in_y = jax.lax.broadcasted_iota(jnp.int32, (H, 1), 0).astype(jnp.float32)

    rows = []
    for b in range(BN):                           # static
        n = nb * BN + b
        t00 = theta_ref[6 * n + 0]
        t01 = theta_ref[6 * n + 1]
        t02 = theta_ref[6 * n + 2]
        t10 = theta_ref[6 * n + 3]
        t11 = theta_ref[6 * n + 4]
        t12 = theta_ref[6 * n + 5]

        # affine_grid + grid_sample unnormalization (align_corners=False), f32.
        xt = t00 * xb + t01 * yb + t02            # (1, TN)
        yt = t10 * xb + t11 * yb + t12            # (1, TN)
        ix = ((xt + 1.0) * W - 1.0) * 0.5
        iy = ((yt + 1.0) * H - 1.0) * 0.5

        # Separable bilinear hats (zeros padding => weights vanish out of bounds).
        wx = jnp.maximum(0.0, 1.0 - jnp.abs(in_x - ix))   # (W, TN) f32
        wy = jnp.maximum(0.0, 1.0 - jnp.abs(in_y - iy))   # (H, TN) f32

        # Contract over input columns on the MXU (bf16 operands, f32 accum).
        a = jnp.dot(y_ref[b], wx.astype(jnp.bfloat16),
                    preferred_element_type=jnp.float32)   # (C*H, TN)

        # Stream the wy-weighted row reduce per channel (bounded temporaries;
        # the cross-sublane sum runs on the XLU slot).
        for c in range(C):
            rows.append(jnp.sum(a[c * H:(c + 1) * H, :] * wy,
                                axis=0, keepdims=True))   # (1, TN)

    out = jnp.concatenate(rows, axis=0)                   # (BN*C, TN)
    o_ref[...] = jnp.clip(out, 0.0, 1.0)                  # single sublane-dense store


def eot_transformer(x, contrast, brightness, theta):
    """x: (N, C, H, W) f32 NCHW; contrast/brightness: (N,); theta: (N, 6)."""
    N, C, H, W = x.shape
    HW = H * W
    CH = C * H
    HW_pad = pl.cdiv(HW, 128) * 128

    vmem_cap = _vmem_capacity_bytes()
    TN = _pick_tile_n(HW_pad, CH)
    BN = _pick_batch_block(N, C, H, W, TN, vmem_cap, _dual_tensorcore())

    # Theta-independent normalized base grid (F.affine_grid, align_corners=False),
    # merged into one (2, HW_pad) array: row 0 = x, row 1 = y.
    oy = jax.lax.broadcasted_iota(jnp.float32, (H, W), 0)
    ox = jax.lax.broadcasted_iota(jnp.float32, (H, W), 1)
    base_x = ((2.0 * ox + 1.0) / W - 1.0).reshape(1, HW)
    base_y = ((2.0 * oy + 1.0) / H - 1.0).reshape(1, HW)
    base = jnp.concatenate([base_x, base_y], axis=0)
    if HW_pad != HW:
        base = jnp.pad(base, ((0, 0), (0, HW_pad - HW)))

    x_rows = x.astype(jnp.float32).reshape(N, CH, W)        # rows = (c, y_in)
    theta_flat = theta.astype(jnp.float32).reshape(N * 6)   # 1-D SMEM (no 2-D pad)
    contrast = contrast.astype(jnp.float32)
    brightness = brightness.astype(jnp.float32)

    # Explicit VMEM budget: double-buffered blocks + scratch + temporaries.
    need = (2 * BN * CH * W * 4          # x block (double-buffered)
            + BN * CH * W * 2            # bf16 photometric scratch
            + 2 * 2 * TN * 4             # base tile
            + 2 * BN * C * TN * 4        # output tile
            + (CH + 2 * H + W + 2 * C) * TN * 4)  # in-kernel temporaries (approx)
    vmem_limit = int(min(int(vmem_cap * 0.9), max(2 * need + (8 << 20), 32 << 20)))

    kernel = functools.partial(_eot_kernel, H=H, W=W, C=C, BN=BN)
    out = pl.pallas_call(
        kernel,
        out_shape=jax.ShapeDtypeStruct((N // BN, BN * C, HW_pad), jnp.float32),
        grid=(N // BN, HW_pad // TN),
        in_specs=[
            pl.BlockSpec(memory_space=pltpu.SMEM),                 # contrast (N,)
            pl.BlockSpec(memory_space=pltpu.SMEM),                 # brightness (N,)
            pl.BlockSpec(memory_space=pltpu.SMEM),                 # theta (N*6,)
            pl.BlockSpec((2, TN), lambda nb, j: (0, j)),           # base grid tile
            pl.BlockSpec((BN, CH, W), lambda nb, j: (nb, 0, 0)),   # x (resident over j)
        ],
        out_specs=pl.BlockSpec((None, BN * C, TN), lambda nb, j: (nb, 0, j)),
        scratch_shapes=[pltpu.VMEM((BN, CH, W), jnp.bfloat16)],    # hoisted photometric
        compiler_params=pltpu.CompilerParams(
            dimension_semantics=("parallel", "arbitrary"),
            vmem_limit_bytes=vmem_limit),
    )(contrast, brightness, theta_flat, base, x_rows)

    out = out.reshape(N, C, HW_pad)[:, :, :HW].reshape(N, C, H, W)
    return out


if __name__ == "__main__":
    N, C, H, W = 2, 4, 16, 16

    # Module hyper-parameters (defaults of EOTTransformer.__init__)
    contrast_min, contrast_max = 0.9, 1.1
    brightness_min, brightness_max = -0.1, 0.1
    rotation = 8.0
    scale_min, scale_max = 0.85, 1.15

    key = jax.random.PRNGKey(0)
    kx, k1, k2, k3, k4 = jax.random.split(key, 5)

    x = jax.random.uniform(kx, (N, C, H, W), dtype=jnp.float32)

    # TODO(synk): the module samples these inside forward() with torch/numpy RNG;
    # here they are sampled host-side with jax.random and passed as inputs.
    contrast = jax.random.uniform(
        k1, (N,), minval=contrast_min, maxval=contrast_max, dtype=jnp.float32)
    # Matches the PyTorch module verbatim: uniform_(-brightness_min, brightness_max)
    brightness = jax.random.uniform(
        k2, (N,), minval=-brightness_min, maxval=brightness_max, dtype=jnp.float32)
    a = jax.random.uniform(
        k3, (N,), minval=-rotation, maxval=rotation, dtype=jnp.float32) / 180.0 * jnp.pi
    s = jax.random.uniform(
        k4, (N,), minval=scale_min, maxval=scale_max, dtype=jnp.float32)
    theta = jnp.stack(
        [jnp.cos(a) * s, -jnp.sin(a) * s, jnp.zeros(N),
         jnp.sin(a) * s, jnp.cos(a) * s, jnp.zeros(N)], axis=1).astype(jnp.float32)

    y = eot_transformer(x, contrast, brightness, theta)
    y = jax.block_until_ready(y)
    assert y.shape == (N, C, H, W)
    assert bool(jnp.all(jnp.isfinite(y)))
    assert bool(jnp.all((y >= 0.0) & (y <= 1.0)))
    print("KERNEL_OK")
</pallas_src>

<mosaic_0001>
module attributes {stable_mosaic.version = 11 : i64} {
  func.func @_eot_kernel(%arg0: i32, %arg1: i32, %arg2: memref<2xf32, #tpu.memory_space<smem>>, %arg3: memref<2xf32, #tpu.memory_space<smem>>, %arg4: memref<12xf32, #tpu.memory_space<smem>>, %arg5: memref<2x256xf32, #tpu.memory_space<vmem>>, %arg6: memref<2x64x16xf32, #tpu.memory_space<vmem>>, %arg7: memref<1x8x256xf32, #tpu.memory_space<vmem>>, %arg8: memref<2x64x16xbf16, #tpu.memory_space<vmem>>) attributes {dimension_semantics = [#tpu.dimension_semantics<parallel>, #tpu.dimension_semantics<arbitrary>], iteration_bounds = array<i64: 1, 1>, scalar_prefetch = 0 : i64, scratch_operands = 1 : i64, tpu.core_type = #tpu.core_type<tc>, window_params = [{transform_indices = @transform_0, window_bounds = array<i64: 2>}, {transform_indices = @transform_1, window_bounds = array<i64: 2>}, {transform_indices = @transform_2, window_bounds = array<i64: 12>}, {transform_indices = @transform_3, window_bounds = array<i64: 2, 256>}, {transform_indices = @transform_4, window_bounds = array<i64: 2, 64, 16>}, {transform_indices = @transform_5, window_bounds = array<i64: 1, 8, 256>}]} {
    %c0_i32 = arith.constant 0 : i32
    %0 = arith.cmpi eq, %arg1, %c0_i32 : i32
    %1 = arith.extui %0 : i1 to i32
    %c0_i32_0 = arith.constant 0 : i32
    %2 = arith.cmpi ne, %1, %c0_i32_0 : i32
    scf.if %2 {
      %c2_i32_67 = arith.constant 2 : i32
      %202 = arith.muli %arg0, %c2_i32_67 : i32
      %c0_i32_68 = arith.constant 0 : i32
      %203 = arith.addi %202, %c0_i32_68 : i32
      %204 = arith.index_cast %203 : i32 to index
      %205 = memref.load %arg2[%204] : memref<2xf32, #tpu.memory_space<smem>>
      %206 = arith.index_cast %203 : i32 to index
      %207 = memref.load %arg3[%206] : memref<2xf32, #tpu.memory_space<smem>>
      %c0_69 = arith.constant 0 : index
      %c0_70 = arith.constant 0 : index
      %c0_71 = arith.constant 0 : index
      %208 = vector.load %arg6[%c0_69, %c0_70, %c0_71] : memref<2x64x16xf32, #tpu.memory_space<vmem>>, vector<1x64x16xf32>
      %209 = vector.shape_cast %208 : vector<1x64x16xf32> to vector<64x16xf32>
      %210 = vector.broadcast %205 : f32 to vector<64x16xf32>
      %211 = arith.mulf %209, %210 : vector<64x16xf32>
      %212 = vector.broadcast %207 : f32 to vector<64x16xf32>
      %213 = arith.addf %211, %212 : vector<64x16xf32>
      %cst_72 = arith.constant 0.000000e+00 : f32
      %cst_73 = arith.constant 1.000000e+00 : f32
      %214 = vector.broadcast %cst_72 : f32 to vector<64x16xf32>
      %215 = arith.maximumf %214, %213 : vector<64x16xf32>
      %216 = vector.broadcast %cst_73 : f32 to vector<64x16xf32>
      %217 = arith.minimumf %216, %215 : vector<64x16xf32>
      %218 = arith.truncf %217 : vector<64x16xf32> to vector<64x16xbf16>
      %c0_74 = arith.constant 0 : index
      %c0_75 = arith.constant 0 : index
      %c0_76 = arith.constant 0 : index
      %219 = vector.load %arg8[%c0_74, %c0_75, %c0_76] : memref<2x64x16xbf16, #tpu.memory_space<vmem>>, vector<1x64x16xbf16>
      %220 = vector.shape_cast %219 : vector<1x64x16xbf16> to vector<64x16xbf16>
      %221 = vector.shape_cast %218 : vector<64x16xbf16> to vector<1x64x16xbf16>
      tpu.vector_store %arg8[%c0_74, %c0_75, %c0_76], %221 {strides = array<i32>} : memref<2x64x16xbf16, #tpu.memory_space<vmem>>, vector<1x64x16xbf16>,
      %c2_i32_77 = arith.constant 2 : i32
      %222 = arith.muli %arg0, %c2_i32_77 : i32
      %c1_i32_78 = arith.constant 1 : i32
      %223 = arith.addi %222, %c1_i32_78 : i32
      %224 = arith.index_cast %223 : i32 to index
      %225 = memref.load %arg2[%224] : memref<2xf32, #tpu.memory_space<smem>>
      %226 = arith.index_cast %223 : i32 to index
      %227 = memref.load %arg3[%226] : memref<2xf32, #tpu.memory_space<smem>>
      %c1_79 = arith.constant 1 : index
      %c0_80 = arith.constant 0 : index
      %c0_81 = arith.constant 0 : index
      %228 = vector.load %arg6[%c1_79, %c0_80, %c0_81] : memref<2x64x16xf32, #tpu.memory_space<vmem>>, vector<1x64x16xf32>
      %229 = vector.shape_cast %228 : vector<1x64x16xf32> to vector<64x16xf32>
      %230 = vector.broadcast %225 : f32 to vector<64x16xf32>
      %231 = arith.mulf %229, %230 : vector<64x16xf32>
      %232 = vector.broadcast %227 : f32 to vector<64x16xf32>
      %233 = arith.addf %231, %232 : vector<64x16xf32>
      %cst_82 = arith.constant 0.000000e+00 : f32
      %cst_83 = arith.constant 1.000000e+00 : f32
      %234 = vector.broadcast %cst_82 : f32 to vector<64x16xf32>
      %235 = arith.maximumf %234, %233 : vector<64x16xf32>
      %236 = vector.broadcast %cst_83 : f32 to vector<64x16xf32>
      %237 = arith.minimumf %236, %235 : vector<64x16xf32>
      %238 = arith.truncf %237 : vector<64x16xf32> to vector<64x16xbf16>
      %c1_84 = arith.constant 1 : index
      %c0_85 = arith.constant 0 : index
      %c0_86 = arith.constant 0 : index
      %239 = vector.load %arg8[%c1_84, %c0_85, %c0_86] : memref<2x64x16xbf16, #tpu.memory_space<vmem>>, vector<1x64x16xbf16>
      %240 = vector.shape_cast %239 : vector<1x64x16xbf16> to vector<64x16xbf16>
      %241 = vector.shape_cast %238 : vector<64x16xbf16> to vector<1x64x16xbf16>
      tpu.vector_store %arg8[%c1_84, %c0_85, %c0_86], %241 {strides = array<i32>} : memref<2x64x16xbf16, #tpu.memory_space<vmem>>, vector<1x64x16xbf16>,
    } else {
    }
    %c0 = arith.constant 0 : index
    %c0_1 = arith.constant 0 : index
    %3 = vector.load %arg5[%c0, %c0_1] : memref<2x256xf32, #tpu.memory_space<vmem>>, vector<2x256xf32>
    %4 = vector.extract_strided_slice %3 {offsets = [0, 0], sizes = [1, 256], strides = [1, 1]} : vector<2x256xf32> to vector<1x256xf32>
    %5 = vector.extract_strided_slice %3 {offsets = [1, 0], sizes = [1, 256], strides = [1, 1]} : vector<2x256xf32> to vector<1x256xf32>
    %6 = tpu.iota {dimensions = array<i32: 0>} : vector<16x1xi32>
    %7 = arith.sitofp %6 : vector<16x1xi32> to vector<16x1xf32>
    %8 = tpu.iota {dimensions = array<i32: 0>} : vector<16x1xi32>
    %9 = arith.sitofp %8 : vector<16x1xi32> to vector<16x1xf32>
    %c2_i32 = arith.constant 2 : i32
    %10 = arith.muli %arg0, %c2_i32 : i32
    %c0_i32_2 = arith.constant 0 : i32
    %11 = arith.addi %10, %c0_i32_2 : i32
    %c6_i32 = arith.constant 6 : i32
    %12 = arith.muli %c6_i32, %11 : i32
    %c0_i32_3 = arith.constant 0 : i32
    %13 = arith.addi %12, %c0_i32_3 : i32
    %14 = arith.index_cast %13 : i32 to index
    %15 = memref.load %arg4[%14] : memref<12xf32, #tpu.memory_space<smem>>
    %c6_i32_4 = arith.constant 6 : i32
    %16 = arith.muli %c6_i32_4, %11 : i32
    %c1_i32 = arith.constant 1 : i32
    %17 = arith.addi %16, %c1_i32 : i32
    %18 = arith.index_cast %17 : i32 to index
    %19 = memref.load %arg4[%18] : memref<12xf32, #tpu.memory_space<smem>>
    %c6_i32_5 = arith.constant 6 : i32
    %20 = arith.muli %c6_i32_5, %11 : i32
    %c2_i32_6 = arith.constant 2 : i32
    %21 = arith.addi %20, %c2_i32_6 : i32
    %22 = arith.index_cast %21 : i32 to index
    %23 = memref.load %arg4[%22] : memref<12xf32, #tpu.memory_space<smem>>
    %c6_i32_7 = arith.constant 6 : i32
    %24 = arith.muli %c6_i32_7, %11 : i32
    %c3_i32 = arith.constant 3 : i32
    %25 = arith.addi %24, %c3_i32 : i32
    %26 = arith.index_cast %25 : i32 to index
    %27 = memref.load %arg4[%26] : memref<12xf32, #tpu.memory_space<smem>>
    %c6_i32_8 = arith.constant 6 : i32
    %28 = arith.muli %c6_i32_8, %11 : i32
    %c4_i32 = arith.constant 4 : i32
    %29 = arith.addi %28, %c4_i32 : i32
    %30 = arith.index_cast %29 : i32 to index
    %31 = memref.load %arg4[%30] : memref<12xf32, #tpu.memory_space<smem>>
    %c6_i32_9 = arith.constant 6 : i32
    %32 = arith.muli %c6_i32_9, %11 : i32
    %c5_i32 = arith.constant 5 : i32
    %33 = arith.addi %32, %c5_i32 : i32
    %34 = arith.index_cast %33 : i32 to index
    %35 = memref.load %arg4[%34] : memref<12xf32, #tpu.memory_space<smem>>
    %36 = vector.broadcast %15 : f32 to vector<1x256xf32>
    %37 = arith.mulf %36, %4 : vector<1x256xf32>
    %38 = vector.broadcast %19 : f32 to vector<1x256xf32>
    %39 = arith.mulf %38, %5 : vector<1x256xf32>
    %40 = arith.addf %37, %39 : vector<1x256xf32>
    %41 = vector.broadcast %23 : f32 to vector<1x256xf32>
    %42 = arith.addf %40, %41 : vector<1x256xf32>
    %43 = vector.broadcast %27 : f32 to vector<1x256xf32>
    %44 = arith.mulf %43, %4 : vector<1x256xf32>
    %45 = vector.broadcast %31 : f32 to vector<1x256xf32>
    %46 = arith.mulf %45, %5 : vector<1x256xf32>
    %47 = arith.addf %44, %46 : vector<1x256xf32>
    %48 = vector.broadcast %35 : f32 to vector<1x256xf32>
    %49 = arith.addf %47, %48 : vector<1x256xf32>
    %cst = arith.constant 1.000000e+00 : f32
    %50 = vector.broadcast %cst : f32 to vector<1x256xf32>
    %51 = arith.addf %42, %50 : vector<1x256xf32>
    %cst_10 = arith.constant 1.600000e+01 : f32
    %52 = vector.broadcast %cst_10 : f32 to vector<1x256xf32>
    %53 = arith.mulf %51, %52 : vector<1x256xf32>
    %cst_11 = arith.constant 1.000000e+00 : f32
    %54 = vector.broadcast %cst_11 : f32 to vector<1x256xf32>
    %55 = arith.subf %53, %54 : vector<1x256xf32>
    %cst_12 = arith.constant 5.000000e-01 : f32
    %56 = vector.broadcast %cst_12 : f32 to vector<1x256xf32>
    %57 = arith.mulf %55, %56 : vector<1x256xf32>
    %cst_13 = arith.constant 1.000000e+00 : f32
    %58 = vector.broadcast %cst_13 : f32 to vector<1x256xf32>
    %59 = arith.addf %49, %58 : vector<1x256xf32>
    %cst_14 = arith.constant 1.600000e+01 : f32
    %60 = vector.broadcast %cst_14 : f32 to vector<1x256xf32>
    %61 = arith.mulf %59, %60 : vector<1x256xf32>
    %cst_15 = arith.constant 1.000000e+00 : f32
    %62 = vector.broadcast %cst_15 : f32 to vector<1x256xf32>
    %63 = arith.subf %61, %62 : vector<1x256xf32>
    %cst_16 = arith.constant 5.000000e-01 : f32
    %64 = vector.broadcast %cst_16 : f32 to vector<1x256xf32>
    %65 = arith.mulf %63, %64 : vector<1x256xf32>
    %66 = vector.broadcast %7 : vector<16x1xf32> to vector<16x256xf32>
    %67 = vector.broadcast %57 : vector<1x256xf32> to vector<16x256xf32>
    %68 = arith.subf %66, %67 : vector<16x256xf32>
    %69 = math.absf %68 : vector<16x256xf32>
    %cst_17 = arith.constant 1.000000e+00 : f32
    %70 = vector.broadcast %cst_17 : f32 to vector<16x256xf32>
    %71 = arith.subf %70, %69 : vector<16x256xf32>
    %cst_18 = arith.constant 0.000000e+00 : f32
    %72 = vector.broadcast %cst_18 : f32 to vector<16x256xf32>
    %73 = arith.maximumf %72, %71 : vector<16x256xf32>
    %74 = vector.broadcast %9 : vector<16x1xf32> to vector<16x256xf32>
    %75 = vector.broadcast %65 : vector<1x256xf32> to vector<16x256xf32>
    %76 = arith.subf %74, %75 : vector<16x256xf32>
    %77 = math.absf %76 : vector<16x256xf32>
    %cst_19 = arith.constant 1.000000e+00 : f32
    %78 = vector.broadcast %cst_19 : f32 to vector<16x256xf32>
    %79 = arith.subf %78, %77 : vector<16x256xf32>
    %cst_20 = arith.constant 0.000000e+00 : f32
    %80 = vector.broadcast %cst_20 : f32 to vector<16x256xf32>
    %81 = arith.maximumf %80, %79 : vector<16x256xf32>
    %c0_21 = arith.constant 0 : index
    %c0_22 = arith.constant 0 : index
    %c0_23 = arith.constant 0 : index
    %82 = vector.load %arg8[%c0_21, %c0_22, %c0_23] : memref<2x64x16xbf16, #tpu.memory_space<vmem>>, vector<1x64x16xbf16>
    %83 = vector.shape_cast %82 : vector<1x64x16xbf16> to vector<64x16xbf16>
    %84 = arith.truncf %73 : vector<16x256xf32> to vector<16x256xbf16>
    %cst_24 = arith.constant dense<0.000000e+00> : vector<64x256xf32>
    %85 = tpu.matmul %83, %84, %cst_24 {dimension_numbers = #tpu.dot_dimension_numbers<[1], [0], [0], [1], [0, 0, 1, 1], [], []>} : vector<64x16xbf16>, vector<16x256xbf16>, vector<64x256xf32> -> vector<64x256xf32>
    %86 = vector.extract_strided_slice %85 {offsets = [0, 0], sizes = [16, 256], strides = [1, 1]} : vector<64x256xf32> to vector<16x256xf32>
    %87 = arith.mulf %86, %81 : vector<16x256xf32>
    %cst_25 = arith.constant dense<0.000000e+00> : vector<256xf32>
    %88 = vector.multi_reduction <add>, %87, %cst_25 [0] : vector<16x256xf32> to vector<256xf32>
    %89 = vector.shape_cast %88 : vector<256xf32> to vector<1x256xf32>
    %90 = vector.extract_strided_slice %85 {offsets = [16, 0], sizes = [16, 256], strides = [1, 1]} : vector<64x256xf32> to vector<16x256xf32>
    %91 = arith.mulf %90, %81 : vector<16x256xf32>
    %cst_26 = arith.constant dense<0.000000e+00> : vector<256xf32>
    %92 = vector.multi_reduction <add>, %91, %cst_26 [0] : vector<16x256xf32> to vector<256xf32>
    %93 = vector.shape_cast %92 : vector<256xf32> to vector<1x256xf32>
    %94 = vector.extract_strided_slice %85 {offsets = [32, 0], sizes = [16, 256], strides = [1, 1]} : vector<64x256xf32> to vector<16x256xf32>
    %95 = arith.mulf %94, %81 : vector<16x256xf32>
    %cst_27 = arith.constant dense<0.000000e+00> : vector<256xf32>
    %96 = vector.multi_reduction <add>, %95, %cst_27 [0] : vector<16x256xf32> to vector<256xf32>
    %97 = vector.shape_cast %96 : vector<256xf32> to vector<1x256xf32>
    %98 = vector.extract_strided_slice %85 {offsets = [48, 0], sizes = [16, 256], strides = [1, 1]} : vector<64x256xf32> to vector<16x256xf32>
    %99 = arith.mulf %98, %81 : vector<16x256xf32>
    %cst_28 = arith.constant dense<0.000000e+00> : vector<256xf32>
    %100 = vector.multi_reduction <add>, %99, %cst_28 [0] : vector<16x256xf32> to vector<256xf32>
    %101 = vector.shape_cast %100 : vector<256xf32> to vector<1x256xf32>
    %c2_i32_29 = arith.constant 2 : i32
    %102 = arith.muli %arg0, %c2_i32_29 : i32
    %c1_i32_30 = arith.constant 1 : i32
    %103 = arith.addi %102, %c1_i32_30 : i32
    %c6_i32_31 = arith.constant 6 : i32
    %104 = arith.muli %c6_i32_31, %103 : i32
    %c0_i32_32 = arith.constant 0 : i32
    %105 = arith.addi %104, %c0_i32_32 : i32
    %106 = arith.index_cast %105 : i32 to index
    %107 = memref.load %arg4[%106] : memref<12xf32, #tpu.memory_space<smem>>
    %c6_i32_33 = arith.constant 6 : i32
    %108 = arith.muli %c6_i32_33, %103 : i32
    %c1_i32_34 = arith.constant 1 : i32
    %109 = arith.addi %108, %c1_i32_34 : i32
    %110 = arith.index_cast %109 : i32 to index
    %111 = memref.load %arg4[%110] : memref<12xf32, #tpu.memory_space<smem>>
    %c6_i32_35 = arith.constant 6 : i32
    %112 = arith.muli %c6_i32_35, %103 : i32
    %c2_i32_36 = arith.constant 2 : i32
    %113 = arith.addi %112, %c2_i32_36 : i32
    %114 = arith.index_cast %113 : i32 to index
    %115 = memref.load %arg4[%114] : memref<12xf32, #tpu.memory_space<smem>>
    %c6_i32_37 = arith.constant 6 : i32
    %116 = arith.muli %c6_i32_37, %103 : i32
    %c3_i32_38 = arith.constant 3 : i32
    %117 = arith.addi %116, %c3_i32_38 : i32
    %118 = arith.index_cast %117 : i32 to index
    %119 = memref.load %arg4[%118] : memref<12xf32, #tpu.memory_space<smem>>
    %c6_i32_39 = arith.constant 6 : i32
    %120 = arith.muli %c6_i32_39, %103 : i32
    %c4_i32_40 = arith.constant 4 : i32
    %121 = arith.addi %120, %c4_i32_40 : i32
    %122 = arith.index_cast %121 : i32 to index
    %123 = memref.load %arg4[%122] : memref<12xf32, #tpu.memory_space<smem>>
    %c6_i32_41 = arith.constant 6 : i32
    %124 = arith.muli %c6_i32_41, %103 : i32
    %c5_i32_42 = arith.constant 5 : i32
    %125 = arith.addi %124, %c5_i32_42 : i32
    %126 = arith.index_cast %125 : i32 to index
    %127 = memref.load %arg4[%126] : memref<12xf32, #tpu.memory_space<smem>>
    %128 = vector.broadcast %107 : f32 to vector<1x256xf32>
    %129 = arith.mulf %128, %4 : vector<1x256xf32>
    %130 = vector.broadcast %111 : f32 to vector<1x256xf32>
    %131 = arith.mulf %130, %5 : vector<1x256xf32>
    %132 = arith.addf %129, %131 : vector<1x256xf32>
    %133 = vector.broadcast %115 : f32 to vector<1x256xf32>
    %134 = arith.addf %132, %133 : vector<1x256xf32>
    %135 = vector.broadcast %119 : f32 to vector<1x256xf32>
    %136 = arith.mulf %135, %4 : vector<1x256xf32>
    %137 = vector.broadcast %123 : f32 to vector<1x256xf32>
    %138 = arith.mulf %137, %5 : vector<1x256xf32>
    %139 = arith.addf %136, %138 : vector<1x256xf32>
    %140 = vector.broadcast %127 : f32 to vector<1x256xf32>
    %141 = arith.addf %139, %140 : vector<1x256xf32>
    %cst_43 = arith.constant 1.000000e+00 : f32
    %142 = vector.broadcast %cst_43 : f32 to vector<1x256xf32>
    %143 = arith.addf %134, %142 : vector<1x256xf32>
    %cst_44 = arith.constant 1.600000e+01 : f32
    %144 = vector.broadcast %cst_44 : f32 to vector<1x256xf32>
    %145 = arith.mulf %143, %144 : vector<1x256xf32>
    %cst_45 = arith.constant 1.000000e+00 : f32
    %146 = vector.broadcast %cst_45 : f32 to vector<1x256xf32>
    %147 = arith.subf %145, %146 : vector<1x256xf32>
    %cst_46 = arith.constant 5.000000e-01 : f32
    %148 = vector.broadcast %cst_46 : f32 to vector<1x256xf32>
    %149 = arith.mulf %147, %148 : vector<1x256xf32>
    %cst_47 = arith.constant 1.000000e+00 : f32
    %150 = vector.broadcast %cst_47 : f32 to vector<1x256xf32>
    %151 = arith.addf %141, %150 : vector<1x256xf32>
    %cst_48 = arith.constant 1.600000e+01 : f32
    %152 = vector.broadcast %cst_48 : f32 to vector<1x256xf32>
    %153 = arith.mulf %151, %152 : vector<1x256xf32>
    %cst_49 = arith.constant 1.000000e+00 : f32
    %154 = vector.broadcast %cst_49 : f32 to vector<1x256xf32>
    %155 = arith.subf %153, %154 : vector<1x256xf32>
    %cst_50 = arith.constant 5.000000e-01 : f32
    %156 = vector.broadcast %cst_50 : f32 to vector<1x256xf32>
    %157 = arith.mulf %155, %156 : vector<1x256xf32>
    %158 = vector.broadcast %7 : vector<16x1xf32> to vector<16x256xf32>
    %159 = vector.broadcast %149 : vector<1x256xf32> to vector<16x256xf32>
    %160 = arith.subf %158, %159 : vector<16x256xf32>
    %161 = math.absf %160 : vector<16x256xf32>
    %cst_51 = arith.constant 1.000000e+00 : f32
    %162 = vector.broadcast %cst_51 : f32 to vector<16x256xf32>
    %163 = arith.subf %162, %161 : vector<16x256xf32>
    %cst_52 = arith.constant 0.000000e+00 : f32
    %164 = vector.broadcast %cst_52 : f32 to vector<16x256xf32>
    %165 = arith.maximumf %164, %163 : vector<16x256xf32>
    %166 = vector.broadcast %9 : vector<16x1xf32> to vector<16x256xf32>
    %167 = vector.broadcast %157 : vector<1x256xf32> to vector<16x256xf32>
    %168 = arith.subf %166, %167 : vector<16x256xf32>
    %169 = math.absf %168 : vector<16x256xf32>
    %cst_53 = arith.constant 1.000000e+00 : f32
    %170 = vector.broadcast %cst_53 : f32 to vector<16x256xf32>
    %171 = arith.subf %170, %169 : vector<16x256xf32>
    %cst_54 = arith.constant 0.000000e+00 : f32
    %172 = vector.broadcast %cst_54 : f32 to vector<16x256xf32>
    %173 = arith.maximumf %172, %171 : vector<16x256xf32>
    %c1 = arith.constant 1 : index
    %c0_55 = arith.constant 0 : index
    %c0_56 = arith.constant 0 : index
    %174 = vector.load %arg8[%c1, %c0_55, %c0_56] : memref<2x64x16xbf16, #tpu.memory_space<vmem>>, vector<1x64x16xbf16>
    %175 = vector.shape_cast %174 : vector<1x64x16xbf16> to vector<64x16xbf16>
    %176 = arith.truncf %165 : vector<16x256xf32> to vector<16x256xbf16>
    %cst_57 = arith.constant dense<0.000000e+00> : vector<64x256xf32>
    %177 = tpu.matmul %175, %176, %cst_57 {dimension_numbers = #tpu.dot_dimension_numbers<[1], [0], [0], [1], [0, 0, 1, 1], [], []>} : vector<64x16xbf16>, vector<16x256xbf16>, vector<64x256xf32> -> vector<64x256xf32>
    %178 = vector.extract_strided_slice %177 {offsets = [0, 0], sizes = [16, 256], strides = [1, 1]} : vector<64x256xf32> to vector<16x256xf32>
    %179 = arith.mulf %178, %173 : vector<16x256xf32>
    %cst_58 = arith.constant dense<0.000000e+00> : vector<256xf32>
    %180 = vector.multi_reduction <add>, %179, %cst_58 [0] : vector<16x256xf32> to vector<256xf32>
    %181 = vector.shape_cast %180 : vector<256xf32> to vector<1x256xf32>
    %182 = vector.extract_strided_slice %177 {offsets = [16, 0], sizes = [16, 256], strides = [1, 1]} : vector<64x256xf32> to vector<16x256xf32>
    %183 = arith.mulf %182, %173 : vector<16x256xf32>
    %cst_59 = arith.constant dense<0.000000e+00> : vector<256xf32>
    %184 = vector.multi_reduction <add>, %183, %cst_59 [0] : vector<16x256xf32> to vector<256xf32>
    %185 = vector.shape_cast %184 : vector<256xf32> to vector<1x256xf32>
    %186 = vector.extract_strided_slice %177 {offsets = [32, 0], sizes = [16, 256], strides = [1, 1]} : vector<64x256xf32> to vector<16x256xf32>
    %187 = arith.mulf %186, %173 : vector<16x256xf32>
    %cst_60 = arith.constant dense<0.000000e+00> : vector<256xf32>
    %188 = vector.multi_reduction <add>, %187, %cst_60 [0] : vector<16x256xf32> to vector<256xf32>
    %189 = vector.shape_cast %188 : vector<256xf32> to vector<1x256xf32>
    %190 = vector.extract_strided_slice %177 {offsets = [48, 0], sizes = [16, 256], strides = [1, 1]} : vector<64x256xf32> to vector<16x256xf32>
    %191 = arith.mulf %190, %173 : vector<16x256xf32>
    %cst_61 = arith.constant dense<0.000000e+00> : vector<256xf32>
    %192 = vector.multi_reduction <add>, %191, %cst_61 [0] : vector<16x256xf32> to vector<256xf32>
    %193 = vector.shape_cast %192 : vector<256xf32> to vector<1x256xf32>
    %194 = tpu.concatenate %89, %93, %97, %101, %181, %185, %189, %193 in 0 : vector<1x256xf32>, vector<1x256xf32>, vector<1x256xf32>, vector<1x256xf32>, vector<1x256xf32>, vector<1x256xf32>, vector<1x256xf32>, vector<1x256xf32> -> vector<8x256xf32>
    %cst_62 = arith.constant 0.000000e+00 : f32
    %cst_63 = arith.constant 1.000000e+00 : f32
    %195 = vector.broadcast %cst_62 : f32 to vector<8x256xf32>
    %196 = arith.maximumf %195, %194 : vector<8x256xf32>
    %197 = vector.broadcast %cst_63 : f32 to vector<8x256xf32>
    %198 = arith.minimumf %197, %196 : vector<8x256xf32>
    %c0_64 = arith.constant 0 : index
    %c0_65 = arith.constant 0 : index
    %c0_66 = arith.constant 0 : index
    %199 = vector.load %arg7[%c0_64, %c0_65, %c0_66] : memref<1x8x256xf32, #tpu.memory_space<vmem>>, vector<1x8x256xf32>
    %200 = vector.shape_cast %199 : vector<1x8x256xf32> to vector<8x256xf32>
    %201 = vector.shape_cast %198 : vector<8x256xf32> to vector<1x8x256xf32>
    tpu.vector_store %arg7[%c0_64, %c0_65, %c0_66], %201 {strides = array<i32>} : memref<1x8x256xf32, #tpu.memory_space<vmem>>, vector<1x8x256xf32>,
    return
  }
  func.func @transform_0(%arg0: i32, %arg1: i32) -> i32 {
    %c0_i32 = arith.constant 0 : i32
    %c0_i32_0 = arith.constant 0 : i32
    return %c0_i32 : i32
  }
  func.func @transform_1(%arg0: i32, %arg1: i32) -> i32 {
    %c0_i32 = arith.constant 0 : i32
    %c0_i32_0 = arith.constant 0 : i32
    return %c0_i32 : i32
  }
  func.func @transform_2(%arg0: i32, %arg1: i32) -> i32 {
    %c0_i32 = arith.constant 0 : i32
    %c0_i32_0 = arith.constant 0 : i32
    return %c0_i32 : i32
  }
  func.func @transform_3(%arg0: i32, %arg1: i32) -> (i32, i32) {
    %c0_i32 = arith.constant 0 : i32
    %c0_i32_0 = arith.constant 0 : i32
    return %c0_i32, %arg1 : i32, i32
  }
  func.func @transform_4(%arg0: i32, %arg1: i32) -> (i32, i32, i32) {
    %c0_i32 = arith.constant 0 : i32
    %c0_i32_0 = arith.constant 0 : i32
    %c0_i32_1 = arith.constant 0 : i32
    return %arg0, %c0_i32, %c0_i32_0 : i32, i32, i32
  }
  func.func @transform_5(%arg0: i32, %arg1: i32) -> (i32, i32, i32) {
    %c0_i32 = arith.constant 0 : i32
    %c0_i32_0 = arith.constant 0 : i32
    return %arg0, %c0_i32, %arg1 : i32, i32, i32
  }
}

</mosaic_0001>

<bundles_post_ra>
// kernel: tpu_custom_call.1
= control target key start
LH: loop header
LB: loop body
LE: loop exit
PB: predicated region body
PF: predicated region fallthrough
CT: control target
= control target key end

     0   :  { %10 = vsyncpa [#allocation5], 0  ;;  %s1348_s0 = inlined_call_operand.vmem [shape: f32[2], index: 0, kind: input, shape index: {}]   ;;  %s1349_s1 = inlined_call_operand.vmem [shape: f32[2], index: 1, kind: input, shape index: {}]   ;;  %s1350_s2 = inlined_call_operand.vmem [shape: f32[12], index: 2, kind: input, shape index: {}]   ;;  %s1351_s3 = inlined_call_operand.vmem [shape: f32[2,256], index: 3, kind: input, shape index: {}]   ;;  %s1352_s4 = inlined_call_operand.vmem [shape: f32[2,64,16], index: 4, kind: input, shape index: {}]   ;;  %s1353_s5 = inlined_call_operand.hbm [shape: f32[1,8,256], index: 5, kind: output, shape index: {}]  }
   0x1   :  { %11 = vsyncpa [#allocation7], 0  ;;  %s29_s20 = sshll.u32 %s1349_s1, 4  ;;  %s30_s20 = int_to_ptr.vmem [resolvable:$true] %s29_s20 }
   0x2   :  { %12 = vsyncpa [#allocation4], 0  ;;  %s19_s23 = sshll.u32 %s1348_s0, 4  ;;  %s976_s24 = scalar_lea.vmem %s30_s20, 16  ;;  %s20_s23 = int_to_ptr.vmem [resolvable:$true] %s19_s23 }
   0x3   :  { %p977_p0 = scmp.ne.s32.totalorder %s30_s20, %s976_s24  ;;  %p981_p1 = scmp.lt.s32.totalorder %s30_s20, %s30_s20 }
   0x4   :  { %p982_p2 = scmp.lt.s32.totalorder %s976_s24, %s976_s24 }
   0x6   :  { %p983_p3 = por %p982_p2, %p981_p1 }
   0x8   :  { %p984_p4 = pnand %p983_p3, %p977_p0 }
   0xa   :  { %987 = shalt.err (!%p984_p4)
}
   0xb   :  { %s1038_s25 = smov [#allocation6]   ;;  %s988_s26 = scalar_lea.vmem %s20_s23, 16 }
   0xc   :  { %32 = dma.vmem_to_smem %s30_s20, 16, %s1038_s25, [#allocation7]  }
   0xd   :  { %p989_p5 = scmp.ne.s32.totalorder %s20_s23, %s988_s26  ;;  %p993_p6 = scmp.lt.s32.totalorder %s20_s23, %s20_s23 }
   0xe   :  { %p994_p7 = scmp.lt.s32.totalorder %s988_s26, %s988_s26 }
  0x10   :  { %p995_p8 = por %p994_p7, %p993_p6 }
  0x12   :  { %p996_p9 = pnand %p995_p8, %p989_p5 }
  0x14   :  { %999 = shalt.err (!%p996_p9)
}
  0x15   :  { %s1039_s1 = smov [#allocation3]   ;;  %s39_s28 = sshll.u32 %s1350_s2, 4  ;;  %s40_s28 = int_to_ptr.vmem [resolvable:$true] %s39_s28 }
  0x16   :  { %22 = dma.vmem_to_smem %s20_s23, 16, %s1039_s1, [#allocation5]  }
  0x17   :  { %s1000_s29 = scalar_lea.vmem %s40_s28, 16  ;;  %p1005_p11 = scmp.lt.s32.totalorder %s40_s28, %s40_s28 }
  0x18   :  { %p1001_p10 = scmp.ne.s32.totalorder %s40_s28, %s1000_s29  ;;  %p1006_p12 = scmp.lt.s32.totalorder %s1000_s29, %s1000_s29 }
  0x1a   :  { %p1007_p13 = por %p1006_p12, %p1005_p11 }
  0x1c   :  { %p1008_p0 = pnand %p1007_p13, %p1001_p10 }
  0x1e   :  { %1011 = shalt.err (!%p1008_p0)
}
  0x1f   :  { %s1040_s30 = smov [#allocation8]  }
  0x20   :  { %42 = dma.vmem_to_smem %s40_s28, 16, %s1040_s30, [#allocation7]  }
  0x21   :  { %1032 = dma.done.wait [#allocation5], 16  }
  0x22   :  { %1033 = vsyncadd [#allocation5], 4294967280 }
  0x23   :  { %1034 = dma.done.wait [#allocation7], 32  }
  0x24   :  { %1035 = vsyncadd [#allocation7], 4294967264 }
  0x25   :  { %56 = sfence }
  0x26   :  { %s242_s6 = sld [smem:[#allocation8]]  ;;  %v1041_v0 = vmov 0   ;;  %v236_v1 = vlaneseq  ;;  %v1089_v2 = vld [vmem:[%s1351_s3] sm:$0xf]  ;;  %v66_v15 = vld [vmem:[%s1352_s4 + $0x8] sm:$0xff]  ;;  %v67_v20 = vld [vmem:[%s1352_s4 + $0x10] sm:$0xff] }
  0x27   :  { %s912_s7 = sld [smem:[#allocation8 + $0x1]]  ;;  %428 = vmatprep.mubr.bf16.mxu0 %v1041_v0  ;;  %730 = vmatprep.mubr.bf16.mxu1 %v1041_v0  ;;  %v65_v14 = vld [vmem:[%s1352_s4] sm:$0xff]  ;;  %v68_v21 = vld [vmem:[%s1352_s4 + $0x18] sm:$0xff]  ;;  %vm139_vm0 = vcmask 125952   ;;  %v897_v31 = vld [vmem:[%s1352_s4 + $0x48] sm:$0xff]  ;;  %vm383_vm1 = vcmask 130048  }
  0x28   :  { %s1084_s2 = sld [smem:[#allocation8 + $0x2]]  ;;  %v237_v3 = vshrl.u32 %v236_v1, 7  ;;  %v896_v26 = vld [vmem:[%s1352_s4 + $0x40] sm:$0xff]  ;;  %v898_v60 = vld [vmem:[%s1352_s4 + $0x50] sm:$0xff]  ;;  %v899_v61 = vld [vmem:[%s1352_s4 + $0x58] sm:$0xff]  ;;  %vm843_vm2 = vcmask 1040384  }
  0x29   :  { %s929_s8 = sld [smem:[#allocation8 + $0x6]]  ;;  %vm846_vm3 = vcmask 1041408   ;;  %vm849_vm4 = vcmask 1042432   ;;  %vm852_vm5 = vcmask 1043456   ;;  %vm855_vm6 = vcmask 1044480   ;;  %s1042_s24 = smov [#allocation9]  }
  0x2a   :  { %s930_s9 = sld [smem:[#allocation8 + $0x7]]  ;;  %v238_v6 = vadd.s32 8, %v237_v3  ;;  %v1097_v10 = vcvt.s32.f32 %v237_v3  ;;  %v1099_v12 = vsub.s32 0, %v237_v3  ;;  %v1108_v17 = vsub.s32 2, %v237_v3  ;;  %s876_s25 = sshll.u32 %s1042_s24, 4  ;;  %s877_s25 = int_to_ptr.vmem [resolvable:$true] %s876_s25 }
  0x2b   :  { %s1091_s12 = sld [smem:[#allocation8 + $0x8]]  ;;  %vm858_vm7 = vcmask 1045504   ;;  %vm861_vm8 = vcmask 1046528   ;;  %s1012_s26 = scalar_lea.vmem %s877_s25, 256 }
  0x2c   :  { %v253_v4 = vstv %s242_s6  ;;  %s63_s13 = sld [smem:[#allocation3]]  ;;  %v1118_v22 = vcvt.s32.f32 %v238_v6  ;;  %p1013_p1 = scmp.ne.s32.totalorder %s877_s25, %s1012_s26 }
  0x2d   :  { %v255_v5 = vstv %s912_s7  ;;  %s64_s14 = sld [smem:[#allocation6]]  ;;  %v254_v7 = vmul.f32 %v253_v4, %v1089_v2  ;;  %p1017_p2 = scmp.lt.s32.totalorder %s877_s25, %s877_s25 }
  0x2e   :  { %v256_v8 = vmul.f32 %v255_v5, %v1089_v2  ;;  %s894_s15 = sld [smem:[#allocation3 + $0x1]]  ;;  %v262_v16 = vstv %s1084_s2  ;;  %p1018_p3 = scmp.lt.s32.totalorder %s1012_s26, %s1012_s26 }
  0x2f   :  { %v555_v9 = vstv %s929_s8  ;;  %s1095_s16 = sld [smem:[#allocation6 + $0x1]] }
  0x30   :  { %v917_v11 = vrot.slane %v256_v8, 9  ;;  %v557_v13 = vstv %s930_s9  ;;  %v556_v18 = vmul.f32 %v555_v9, %v1089_v2  ;;  %v69_v8 = vld [vmem:[%s1352_s4 + $0x20] sm:$0xff]  ;;  %s933_s19 = sld [smem:[#allocation8 + $0xa]]  ;;  %p1019_p4 = por %p1018_p3, %p1017_p2 }
  0x31   :  { %v558_v19 = vmul.f32 %v557_v13, %v1089_v2  ;;  %v564_v24 = vstv %s1091_s12  ;;  %s914_s20 = sld [smem:[#allocation8 + $0x3]] }
  0x32   :  { %v261_v23 = vadd.f32 %v917_v11, %v254_v7  ;;  %v1121_v25 = vstv %s63_s13  ;;  %s932_s21 = sld [smem:[#allocation8 + $0x9]]  ;;  %p1020_p5 = pnand %p1019_p4, %p1013_p1 }
  0x33   :  { %v935_v27 = vrot.slane %v558_v19, 9  ;;  %v74_v28 = vmul.f32 %v1121_v25, %v65_v14  ;;  %v75_v29 = vmul.f32 %v1121_v25, %v66_v15  ;;  %v1128_v30 = vstv %s64_s14  ;;  %v70_v15 = vld [vmem:[%s1352_s4 + $0x28] sm:$0xff]  ;;  %s916_s22 = sld [smem:[#allocation8 + $0x5]] }
  0x34   :  { %v263_v32 = vadd.f32 %v262_v16, %v261_v23  ;;  %v1133_v33 = vstv %s894_s15  ;;  %v76_v34 = vmul.f32 %v1121_v25, %v67_v20  ;;  %v77_v35 = vmul.f32 %v1121_v25, %v68_v21  ;;  %v900_v16 = vld [vmem:[%s1352_s4 + $0x60] sm:$0xff]  ;;  %s934_s23 = sld [smem:[#allocation8 + $0xb]] }
  0x35   :  { %v563_v36 = vadd.f32 %v935_v27, %v556_v18  ;;  %v83_v37 = vadd.f32 %v1128_v30, %v74_v28  ;;  %v84_v38 = vadd.f32 %v1128_v30, %v75_v29  ;;  %v161_v39 = vmul.f32 %v896_v26, %v1133_v33 }
  0x36   :  { %v275_v40 = vadd.f32 1.0, %v263_v32  ;;  %v162_v41 = vmul.f32 %v897_v31, %v1133_v33  ;;  %v1142_v42 = vstv %s1095_s16  ;;  %v85_v43 = vadd.f32 %v1128_v30, %v76_v34 }
  0x37   :  { %v565_v44 = vadd.f32 %v564_v24, %v563_v36  ;;  %v91_v45 = vmax.f32 %v83_v37, 0.0  ;;  %v92_v46 = vmax.f32 %v84_v38, 0.0  ;;  %v170_v47 = vadd.f32 %v1142_v42, %v161_v39 }
  0x38   :  { %v276_v48 = vmul.f32 16.0, %v275_v40  ;;  %v171_v49 = vadd.f32 %v1142_v42, %v162_v41  ;;  %v86_v50 = vadd.f32 %v1128_v30, %v77_v35  ;;  %v93_v51 = vmax.f32 %v85_v43, 0.0 }
  0x39   :  { %v577_v52 = vadd.f32 1.0, %v565_v44  ;;  %v99_v53 = vmin.f32 %v91_v45, 1.0  ;;  %v100_v54 = vmin.f32 %v92_v46, 1.0  ;;  %v178_v55 = vmax.f32 %v170_v47, 0.0 }
  0x3a   :  { %v919_v56 = vadd.f32 -1.0, %v276_v48  ;;  %v179_v57 = vmax.f32 %v171_v49, 0.0  ;;  %v94_v58 = vmax.f32 %v86_v50, 0.0  ;;  %v101_v59 = vmin.f32 %v93_v51, 1.0 }
  0x3b   :  { %v578_v62 = vmul.f32 16.0, %v577_v52  ;;  %v947_v63 = vpack.c.bf16 %v99_v53, %v99_v53  ;;  %v948_v1 = vpack.c.bf16 %v100_v54, %v100_v54  ;;  %v186_v3 = vmin.f32 %v178_v55, 1.0 }
  0x3c   :  { %v278_v4 = vmul.f32 0.5, %v919_v56  ;;  %v187_v5 = vmin.f32 %v179_v57, 1.0  ;;  %v102_v6 = vmin.f32 %v94_v58, 1.0  ;;  %v949_v7 = vpack.c.bf16 %v101_v59, %v101_v59 }
  0x3d   :  { %v937_v9 = vadd.f32 -1.0, %v578_v62  ;;  %140 = vst.msk [vmem:[#allocation2] sm:$0xf] %vm139_vm0, %v947_v63  ;;  %141 = vst.msk [vmem:[#allocation2 + $0x4] sm:$0xf] %vm139_vm0, %v948_v1  ;;  %v955_v11 = vpack.c.bf16 %v186_v3, %v186_v3  ;;  %v163_v13 = vmul.f32 %v898_v60, %v1133_v33  ;;  %v164_v14 = vmul.f32 %v899_v61, %v1133_v33 }
  0x3e   :  { %v291_v18 = vrot.slane %v278_v4, %v1108_v17  ;;  %v287_v19 = vrot.slane %v278_v4, %v1099_v12  ;;  %v956_v20 = vpack.c.bf16 %v187_v5, %v187_v5  ;;  %v950_v21 = vpack.c.bf16 %v102_v6, %v102_v6  ;;  %142 = vst.msk [vmem:[#allocation2 + $0x8] sm:$0xf] %vm139_vm0, %v949_v7 }
  0x3f   :  { %v580_v23 = vmul.f32 0.5, %v937_v9  ;;  %227 = vst.msk [vmem:[#allocation2 + $0x20] sm:$0xf] %vm139_vm0, %v955_v11  ;;  %v172_v24 = vadd.f32 %v1142_v42, %v163_v13  ;;  %v173_v26 = vadd.f32 %v1142_v42, %v164_v14  ;;  %v78_v27 = vmul.f32 %v1121_v25, %v69_v8  ;;  %v901_v9 = vld [vmem:[%s1352_s4 + $0x68] sm:$0xff] }
  0x40   :  { %v301_v28 = vrot.slane %v291_v18, %v1099_v12  ;;  %v297_v29 = vrot.slane %v287_v19, %v1099_v12  ;;  %228 = vst.msk [vmem:[#allocation2 + $0x24] sm:$0xf] %vm139_vm0, %v956_v20  ;;  %143 = vst.msk [vmem:[#allocation2 + $0xc] sm:$0xf] %vm139_vm0, %v950_v21  ;;  %v79_v31 = vmul.f32 %v1121_v25, %v70_v15 }
  0x41   :  { %v165_v32 = vmul.f32 %v900_v16, %v1133_v33  ;;  %v593_v34 = vrot.slane %v580_v23, %v1108_v17  ;;  %v589_v35 = vrot.slane %v580_v23, %v1099_v12  ;;  %v180_v36 = vmax.f32 %v172_v24, 0.0  ;;  %v71_v16 = vld [vmem:[%s1352_s4 + $0x30] sm:$0xff]  ;;  %v72_v23 = vld [vmem:[%s1352_s4 + $0x38] sm:$0xff] }
  0x42   :  { %v181_v37 = vmax.f32 %v173_v26, 0.0  ;;  %v303_v38 = vsub.f32 %v1097_v10, %v301_v28  ;;  %v305_v39 = vsub.f32 %v1118_v22, %v301_v28  ;;  %v302_v40 = vsub.f32 %v1097_v10, %v297_v29 }
  0x43   :  { %v304_v41 = vsub.f32 %v1118_v22, %v297_v29  ;;  %v603_v43 = vrot.slane %v593_v34, %v1099_v12  ;;  %v599_v44 = vrot.slane %v589_v35, %v1099_v12  ;;  %v188_v45 = vmin.f32 %v180_v36, 1.0 }
  0x44   :  { %v189_v46 = vmin.f32 %v181_v37, 1.0  ;;  %v307_v47 = vand.u32 2147483647, %v303_v38  ;;  %v309_v48 = vand.u32 2147483647, %v305_v39  ;;  %v87_v50 = vadd.f32 %v1128_v30, %v78_v27  ;;  %v968_v26 = vld [vmem:[#allocation2] sm:$0xff]  }
  0x45   :  { %v306_v49 = vand.u32 2147483647, %v302_v40  ;;  %v605_v51 = vsub.f32 %v1097_v10, %v603_v43  ;;  %v607_v52 = vsub.f32 %v1118_v22, %v603_v43  ;;  %v308_v53 = vand.u32 2147483647, %v304_v41  ;;  %v903_v43 = vld [vmem:[%s1352_s4 + $0x78] sm:$0xff] }
  0x46   :  { %v604_v54 = vsub.f32 %v1097_v10, %v599_v44  ;;  %v311_v55 = vsub.f32 1.0, %v307_v47  ;;  %v313_v56 = vsub.f32 1.0, %v309_v48  ;;  %v606_v58 = vsub.f32 %v1118_v22, %v599_v44 }
  0x47   :  { %v310_v57 = vsub.f32 1.0, %v306_v49  ;;  %v609_v59 = vand.u32 2147483647, %v605_v51  ;;  %v611_v60 = vand.u32 2147483647, %v607_v52  ;;  %v312_v61 = vsub.f32 1.0, %v308_v53 }
  0x48   :  { %v957_v62 = vpack.c.bf16 %v188_v45, %v188_v45  ;;  %v315_v63 = vmax.f32 %v311_v55, 0.0  ;;  %v317_v1 = vmax.f32 %v313_v56, 0.0  ;;  %v608_v4 = vand.u32 2147483647, %v604_v54 }
  0x49   :  { %v314_v3 = vmax.f32 %v310_v57, 0.0  ;;  %v613_v5 = vsub.f32 1.0, %v609_v59  ;;  %v615_v6 = vsub.f32 1.0, %v611_v60  ;;  %v316_v7 = vmax.f32 %v312_v61, 0.0  ;;  %v970_v60 = vld [vmem:[#allocation2 + $0x8] sm:$0xff]  }
  0x4a   :  { %v610_v8 = vand.u32 2147483647, %v606_v58  ;;  %229 = vst.msk [vmem:[#allocation2 + $0x28] sm:$0xf] %vm139_vm0, %v957_v62  ;;  %v362_v11 = vpack.c.bf16 %v317_v1, %v315_v63  ;;  %v612_v13 = vsub.f32 1.0, %v608_v4  ;;  %v958_v14 = vpack.c.bf16 %v189_v46, %v189_v46 }
  0x4b   :  { %v88_v15 = vadd.f32 %v1128_v30, %v79_v31  ;;  %v617_v18 = vmax.f32 %v613_v5, 0.0  ;;  %v619_v19 = vmax.f32 %v615_v6, 0.0  ;;  %v361_v20 = vpack.c.bf16 %v316_v7, %v314_v3  ;;  %v902_v31 = vld [vmem:[%s1352_s4 + $0x70] sm:$0xff]  ;;  %s915_s4 = sld [smem:[#allocation8 + $0x4]] }
  0x4c   :  { %v614_v21 = vsub.f32 1.0, %v610_v8  ;;  %410 = vmatprep.subr.bf16.mxu0 %v362_v11  ;;  %v616_v24 = vmax.f32 %v612_v13, 0.0  ;;  %230 = vst.msk [vmem:[#allocation2 + $0x2c] sm:$0xf] %vm139_vm0, %v958_v14  ;;  %v95_v27 = vmax.f32 %v87_v50, 0.0  ;;  %v166_v29 = vmul.f32 %v901_v9, %v1133_v33 }
  0x4d   :  { %v96_v28 = vmax.f32 %v88_v15, 0.0  ;;  %v665_v34 = vpack.c.bf16 %v619_v19, %v617_v18  ;;  %411 = vmatpush1.bf16.msra.mxu0 %v361_v20  ;;  %v174_v36 = vadd.f32 %v1142_v42, %v165_v32  ;;  %v80_v37 = vmul.f32 %v1121_v25, %v71_v16  ;;  %v969_v32 = vld [vmem:[#allocation2 + $0x20] sm:$0xff]  }
  0x4e   :  { %v618_v35 = vmax.f32 %v614_v21, 0.0  ;;  %v103_v38 = vmin.f32 %v95_v27, 1.0  ;;  %v175_v40 = vadd.f32 %v1142_v42, %v166_v29  ;;  %v81_v41 = vmul.f32 %v1121_v25, %v72_v23 }
  0x4f   :  { %v104_v39 = vmin.f32 %v96_v28, 1.0  ;;  %712 = vmatprep.subr.bf16.mxu1 %v665_v34  ;;  %v182_v45 = vmax.f32 %v174_v36, 0.0  ;;  %v89_v46 = vadd.f32 %v1128_v30, %v80_v37  ;;  %v167_v47 = vmul.f32 %v902_v31, %v1133_v33 }
  0x50   :  { %v664_v44 = vpack.c.bf16 %v618_v35, %v616_v24  ;;  %925 = vmatmul.mubr.msk.bf16.vlgmr.msra.gmra.mxu0 %vm383_vm1, %v968_v26  ;;  %v951_v48 = vpack.c.bf16 %v103_v38, %v103_v38  ;;  %v183_v50 = vmax.f32 %v175_v40, 0.0  ;;  %v90_v51 = vadd.f32 %v1128_v30, %v81_v41 }
  0x51   :  { %v952_v49 = vpack.c.bf16 %v104_v39, %v104_v39  ;;  %438 = vmatprep.mubr.bf16.mxu0 %v1041_v0  ;;  %v190_v25 = vmin.f32 %v182_v45, 1.0  ;;  %v97_v52 = vmax.f32 %v89_v46, 0.0  ;;  %v168_v53 = vmul.f32 %v903_v43, %v1133_v33 }
  0x52   :  { %713 = vmatpush1.bf16.msra.mxu1 %v664_v44  ;;  %v176_v54 = vadd.f32 %v1142_v42, %v167_v47  ;;  %144 = vst.msk [vmem:[#allocation2 + $0x10] sm:$0xf] %vm139_vm0, %v951_v48  ;;  %v191_v55 = vmin.f32 %v183_v50, 1.0  ;;  %v98_v56 = vmax.f32 %v90_v51, 0.0  ;;  %v266_v13 = vstv %s915_s4 }
  0x53   :  { %145 = vst.msk [vmem:[#allocation2 + $0x14] sm:$0xf] %vm139_vm0, %v952_v49  ;;  %v959_v57 = vpack.c.bf16 %v190_v25, %v190_v25  ;;  %v105_v58 = vmin.f32 %v97_v52, 1.0  ;;  %v177_v59 = vadd.f32 %v1142_v42, %v168_v53  ;;  %v971_v5 = vld [vmem:[#allocation2 + $0x28] sm:$0xff]   ;;  %v568_v14 = vstv %s933_s19 }
  0x54   :  { %v184_v30 = vmax.f32 %v176_v54, 0.0  ;;  %v960_v61 = vpack.c.bf16 %v191_v55, %v191_v55  ;;  %v106_v62 = vmin.f32 %v98_v56, 1.0  ;;  %v267_v15 = vmul.f32 %v266_v13, %v1089_v2 }
  0x55   :  { %943 = vmatmul.mubr.msk.bf16.vlgmr.msra.gmra.mxu1 %vm383_vm1, %v969_v32  ;;  %231 = vst.msk [vmem:[#allocation2 + $0x30] sm:$0xf] %vm139_vm0, %v959_v57  ;;  %v953_v33 = vpack.c.bf16 %v105_v58, %v105_v58  ;;  %v185_v63 = vmax.f32 %v177_v59, 0.0  ;;  %v264_v16 = vstv %s914_s20  ;;  %v569_v18 = vmul.f32 %v568_v14, %v1089_v2 }
  0x56   :  { %740 = vmatprep.mubr.bf16.mxu1 %v1041_v0  ;;  %v192_v1 = vmin.f32 %v184_v30, 1.0  ;;  %232 = vst.msk [vmem:[#allocation2 + $0x34] sm:$0xf] %vm139_vm0, %v960_v61  ;;  %v954_v3 = vpack.c.bf16 %v106_v62, %v106_v62  ;;  %v566_v19 = vstv %s932_s21  ;;  %v918_v20 = vrot.slane %v267_v15, 9 }
  0x57   :  { %146 = vst.msk [vmem:[#allocation2 + $0x18] sm:$0xf] %vm139_vm0, %v953_v33  ;;  %v193_v4 = vmin.f32 %v185_v63, 1.0  ;;  %v567_v21 = vmul.f32 %v566_v19, %v1089_v2  ;;  %v936_v23 = vrot.slane %v569_v18, 9  ;;  %v273_v26 = vstv %s916_s22 }
  0x58   :  { %v961_v42 = vpack.c.bf16 %v192_v1, %v192_v1  ;;  %926 = vmatmul.mubr.msk.bf16.gmra.mxu0 %vm383_vm1, %v970_v60  ;;  %147 = vst.msk [vmem:[#allocation2 + $0x1c] sm:$0xf] %vm139_vm0, %v954_v3  ;;  %v575_v28 = vstv %s934_s23 }
  0x59   :  { %448 = vmatprep.mubr.bf16.mxu0 %v1041_v0  ;;  %v962_v6 = vpack.c.bf16 %v193_v4, %v193_v4  ;;  %v574_v27 = vadd.f32 %v936_v23, %v567_v21 }
  0x5a   :  { %233 = vst.msk [vmem:[#allocation2 + $0x38] sm:$0xf] %vm139_vm0, %v961_v42  ;;  %v972_v7 = vld [vmem:[#allocation2 + $0x10] sm:$0xff]  }
  0x5b   :  { %234 = vst.msk [vmem:[#allocation2 + $0x3c] sm:$0xf] %vm139_vm0, %v962_v6  ;;  %v576_v31 = vadd.f32 %v575_v28, %v574_v27 }
  0x5d   :  { %944 = vmatmul.mubr.msk.bf16.gmra.mxu1 %vm383_vm1, %v971_v5  ;;  %v973_v8 = vld [vmem:[#allocation2 + $0x30] sm:$0xff]   ;;  %v581_v35 = vadd.f32 1.0, %v576_v31 }
  0x5e   :  { %750 = vmatprep.mubr.bf16.mxu1 %v1041_v0 }
  0x5f   :  { %v974_v9 = vld [vmem:[#allocation2 + $0x18] sm:$0xff]   ;;  %v582_v37 = vmul.f32 16.0, %v581_v35 }
  0x60   :  { %927 = vmatmul.mubr.msk.bf16.gmra.mxu0 %vm383_vm1, %v972_v7 }
  0x61   :  { %458 = vmatprep.mubr.bf16.mxu0 %v1041_v0  ;;  %v938_v39 = vadd.f32 -1.0, %v582_v37 }
  0x62   :  { %v975_v11 = vld [vmem:[#allocation2 + $0x38] sm:$0xff]  }
  0x63   :  { %v584_v41 = vmul.f32 0.5, %v938_v39 }
  0x65   :  { %945 = vmatmul.mubr.msk.bf16.gmra.mxu1 %vm383_vm1, %v973_v8  ;;  %v624_v44 = vrot.slane %v584_v41, %v1099_v12  ;;  %v628_v48 = vrot.slane %v584_v41, %v1108_v17 }
  0x66   :  { %760 = vmatprep.mubr.bf16.mxu1 %v1041_v0  ;;  %v265_v0 = vmul.f32 %v264_v16, %v1089_v2 }
  0x67   :  { %v634_v46 = vrot.slane %v624_v44, %v1099_v12  ;;  %v638_v53 = vrot.slane %v628_v48, %v1099_v12 }
  0x68   :  { %928 = vmatmul.mubr.msk.bf16.gmra.mxu0 %vm383_vm1, %v974_v9  ;;  %v272_v24 = vadd.f32 %v918_v20, %v265_v0 }
  0x69   :  { %v639_v50 = vsub.f32 %v1097_v10, %v634_v46  ;;  %v641_v55 = vsub.f32 %v1118_v22, %v634_v46  ;;  %v642_v58 = vsub.f32 %v1118_v22, %v638_v53  ;;  %v640_v30 = vsub.f32 %v1097_v10, %v638_v53 }
  0x6a   :  { %v274_v29 = vadd.f32 %v273_v26, %v272_v24 }
  0x6b   :  { %v643_v56 = vand.u32 2147483647, %v639_v50  ;;  %v645_v61 = vand.u32 2147483647, %v641_v55  ;;  %v646_v63 = vand.u32 2147483647, %v642_v58 }
  0x6c   :  { %v279_v34 = vadd.f32 1.0, %v274_v29 }
  0x6d   :  { %946 = vmatmul.mubr.msk.bf16.gmra.mxu1 %vm383_vm1, %v975_v11  ;;  %v647_v62 = vsub.f32 1.0, %v643_v56  ;;  %v649_v5 = vsub.f32 1.0, %v645_v61  ;;  %v650_v8 = vsub.f32 1.0, %v646_v63 }
  0x6e   :  { %v280_v36 = vmul.f32 16.0, %v279_v34 }
  0x6f   :  { %v1268_v7 = vmax.f32 %v647_v62, 0.0  ;;  %v1276_v16 = vmax.f32 %v649_v5, 0.0  ;;  %v1280_v23 = vmax.f32 %v650_v8, 0.0 }
  0x70   :  { %v920_v38 = vadd.f32 -1.0, %v280_v36 }
  0x72   :  { %v282_v40 = vmul.f32 0.5, %v920_v38 }
  0x74   :  { %v322_v43 = vrot.slane %v282_v40, %v1099_v12  ;;  %v326_v2 = vrot.slane %v282_v40, %v1108_v17 }
  0x76   :  { %v332_v45 = vrot.slane %v322_v43, %v1099_v12  ;;  %v336_v47 = vrot.slane %v326_v2, %v1099_v12  ;;  %v644_v12 = vand.u32 2147483647, %v640_v30 }
  0x78   :  { %v337_v32 = vsub.f32 %v1097_v10, %v332_v45  ;;  %v339_v49 = vsub.f32 %v1118_v22, %v332_v45  ;;  %v340_v51 = vsub.f32 %v1118_v22, %v336_v47  ;;  %v338_v25 = vsub.f32 %v1097_v10, %v336_v47 }
  0x79   :  { %v648_v14 = vsub.f32 1.0, %v644_v12 }
  0x7a   :  { %v341_v52 = vand.u32 2147483647, %v337_v32  ;;  %v343_v54 = vand.u32 2147483647, %v339_v49  ;;  %v344_v57 = vand.u32 2147483647, %v340_v51 }
  0x7b   :  { %v342_v59 = vand.u32 2147483647, %v338_v25  ;;  %v1283_v28 = vmax.f32 %v648_v14, 0.0 }
  0x7c   :  { %v345_v17 = vsub.f32 1.0, %v341_v52  ;;  %v347_v60 = vsub.f32 1.0, %v343_v54  ;;  %v348_v33 = vsub.f32 1.0, %v344_v57 }
  0x7d   :  { %v346_v3 = vsub.f32 1.0, %v342_v59 }
  0x7e   :  { %v1264_v4 = vmax.f32 %v345_v17, 0.0  ;;  %v1266_v42 = vmax.f32 %v347_v60, 0.0  ;;  %v1270_v22 = vmax.f32 %v348_v33, 0.0 }
  0x7f   :  { %v1272_v9 = vmax.f32 %v346_v3, 0.0 }
 0x110   :  { %v430_v1 = vpop.f32.mrf.mxu0 }
 0x111   :  { %v469_v13 = vmul.f32 %v430_v1, %v1264_v4 }
 0x112   :  { %v432_v6 = vpop.f32.mrf.mxu0 }
 0x113   :  { %v470_v24 = vmul.f32 %v432_v6, %v1272_v9 }
 0x114   :  { %v434_v11 = vpop.f32.mrf.mxu0 }
 0x115   :  { %v732_v10 = vpop.f32.mrf.mxu1  ;;  %v471_v15 = vmul.f32 %v434_v11, %v1266_v42 }
 0x116   :  { %v436_v19 = vpop.f32.mrf.mxu0  ;;  %v771_v0 = vmul.f32 %v732_v10, %v1268_v7 }
 0x117   :  { %v734_v18 = vpop.f32.mrf.mxu1  ;;  %v473_v20 = vadd.f32 %v471_v15, %v469_v13  ;;  %v472_v21 = vmul.f32 %v436_v19, %v1270_v22 }
 0x118   :  { %v440_v27 = vpop.f32.mrf.mxu0  ;;  %v772_v41 = vmul.f32 %v734_v18, %v1283_v28 }
 0x119   :  { %v736_v26 = vpop.f32.mrf.mxu1  ;;  %v474_v31 = vrot.slane %v473_v20, 4  ;;  %v480_v34 = vadd.f32 %v472_v21, %v470_v24  ;;  %v487_v52 = vmul.f32 %v440_v27, %v1264_v4 }
 0x11a   :  { %v773_v29 = vmul.f32 %v736_v26, %v1276_v16  ;;  %v442_v36 = vpop.f32.mrf.mxu0 }
 0x11b   :  { %v738_v35 = vpop.f32.mrf.mxu1  ;;  %v475_v43 = vadd.f32 %v474_v31, %v473_v20  ;;  %v481_v44 = vrot.slane %v480_v34, 4  ;;  %v488_v53 = vmul.f32 %v442_v36, %v1272_v9 }
 0x11c   :  { %v775_v37 = vadd.f32 %v773_v29, %v771_v0  ;;  %v774_v38 = vmul.f32 %v738_v35, %v1280_v23  ;;  %v444_v40 = vpop.f32.mrf.mxu0 }
 0x11d   :  { %v742_v39 = vpop.f32.mrf.mxu1  ;;  %v489_v32 = vmul.f32 %v444_v40, %v1266_v42  ;;  %v476_v51 = vrot.slane %v475_v43, 2  ;;  %v482_v25 = vadd.f32 %v481_v44, %v480_v34 }
 0x11e   :  { %v446_v45 = vpop.f32.mrf.mxu0  ;;  %v776_v46 = vrot.slane %v775_v37, 4  ;;  %v782_v47 = vadd.f32 %v774_v38, %v772_v41  ;;  %v789_v60 = vmul.f32 %v742_v39, %v1268_v7 }
 0x11f   :  { %v744_v2 = vpop.f32.mrf.mxu1  ;;  %v490_v49 = vmul.f32 %v446_v45, %v1270_v22  ;;  %v491_v58 = vadd.f32 %v489_v32, %v487_v52  ;;  %v477_v61 = vadd.f32 %v476_v51, %v475_v43  ;;  %v483_v62 = vrot.slane %v482_v25, 2 }
 0x120   :  { %v450_v50 = vpop.f32.mrf.mxu0  ;;  %v777_v56 = vadd.f32 %v776_v46, %v775_v37  ;;  %v783_v57 = vrot.slane %v782_v47, 4  ;;  %v790_v6 = vmul.f32 %v744_v2, %v1283_v28 }
 0x121   :  { %v746_v48 = vpop.f32.mrf.mxu1  ;;  %v498_v59 = vadd.f32 %v490_v49, %v488_v53  ;;  %v492_v8 = vrot.slane %v491_v58, 4  ;;  %v505_v11 = vmul.f32 %v450_v50, %v1264_v4  ;;  %v478_v21 = vrot.slane %v477_v61, 1 }
 0x122   :  { %v452_v55 = vpop.f32.mrf.mxu0  ;;  %v791_v33 = vmul.f32 %v746_v48, %v1276_v16  ;;  %v778_v12 = vrot.slane %v777_v56, 2  ;;  %v784_v5 = vadd.f32 %v783_v57, %v782_v47  ;;  %v1302_v24 = vadd.f32 %v483_v62, %v482_v25 }
 0x123   :  { %v748_v54 = vpop.f32.mrf.mxu1  ;;  %v499_v10 = vrot.slane %v498_v59, 4  ;;  %v506_v18 = vmul.f32 %v452_v55, %v1272_v9  ;;  %v493_v40 = vadd.f32 %v492_v8, %v491_v58  ;;  %v1308_v25 = vadd.f32 %v478_v21, %v477_v61 }
 0x124   :  { %v454_v30 = vpop.f32.mrf.mxu0  ;;  %v792_v63 = vmul.f32 %v748_v54, %v1280_v23  ;;  %v793_v26 = vadd.f32 %v791_v33, %v789_v60  ;;  %v1306_v38 = vadd.f32 %v778_v12, %v777_v56  ;;  %v785_v39 = vrot.slane %v784_v5, 2 }
 0x125   :  { %v752_v17 = vpop.f32.mrf.mxu1  ;;  %v507_v19 = vmul.f32 %v454_v30, %v1266_v42  ;;  %v500_v41 = vadd.f32 %v499_v10, %v498_v59  ;;  %v485_v53 = vrot.slane %v1302_v24, 1  ;;  %v494_v56 = vrot.slane %v493_v40, 2 }
 0x126   :  { %v456_v3 = vpop.f32.mrf.mxu0  ;;  %v807_v13 = vmul.f32 %v752_v17, %v1268_v7  ;;  %v800_v27 = vadd.f32 %v792_v63, %v790_v6  ;;  %v794_v32 = vrot.slane %v793_v26, 4  ;;  %v780_v52 = vrot.slane %v1306_v38, 1 }
 0x127   :  { %v754_v1 = vpop.f32.mrf.mxu1  ;;  %v508_v20 = vmul.f32 %v456_v3, %v1270_v22  ;;  %v509_v35 = vadd.f32 %v507_v19, %v505_v11  ;;  %v1312_v54 = vadd.f32 %v785_v39, %v784_v5  ;;  %v501_v57 = vrot.slane %v500_v41, 2 }
 0x128   :  { %v460_v15 = vpop.f32.mrf.mxu0  ;;  %v808_v34 = vmul.f32 %v754_v1, %v1283_v28  ;;  %v801_v48 = vrot.slane %v800_v27, 4  ;;  %v795_v30 = vadd.f32 %v794_v32, %v793_v26  ;;  %v495_v11 = vadd.f32 %v494_v56, %v493_v40 }
 0x129   :  { %v756_v14 = vpop.f32.mrf.mxu1  ;;  %v516_v36 = vadd.f32 %v508_v20, %v506_v18  ;;  %v510_v44 = vrot.slane %v509_v35, 4  ;;  %v523_v62 = vmul.f32 %v460_v15, %v1264_v4  ;;  %v486_v56 = vadd.f32 %v485_v53, %v1302_v24 }
 0x12a   :  { %v809_v0 = vmul.f32 %v756_v14, %v1276_v16  ;;  %v462_v31 = vpop.f32.mrf.mxu0  ;;  %v802_v60 = vadd.f32 %v801_v48, %v800_v27  ;;  %v496_v26 = vrot.slane %v495_v11, 1  ;;  %v781_v24 = vadd.f32 %v780_v52, %v1306_v38 }
 0x12b   :  { %v758_v29 = vpop.f32.mrf.mxu1  ;;  %v517_v45 = vrot.slane %v516_v36, 4  ;;  %v511_v50 = vadd.f32 %v510_v44, %v509_v35  ;;  %v524_v3 = vmul.f32 %v462_v31, %v1272_v9  ;;  %v796_v9 = vrot.slane %v795_v30, 2 }
 0x12c   :  { %v810_v37 = vmul.f32 %v758_v29, %v1280_v23  ;;  %v811_v2 = vadd.f32 %v809_v0, %v807_v13  ;;  %v464_v47 = vpop.f32.mrf.mxu0  ;;  %v502_v13 = vadd.f32 %v501_v57, %v500_v41  ;;  %v803_v0 = vrot.slane %v802_v60, 2 }
 0x12d   :  { %v762_v43 = vpop.f32.mrf.mxu1  ;;  %v518_v51 = vadd.f32 %v517_v45, %v516_v36  ;;  %v512_v63 = vrot.slane %v511_v50, 2  ;;  %v525_v5 = vmul.f32 %v464_v47, %v1266_v42  ;;  %v787_v57 = vrot.slane %v1312_v54, 1 }
 0x12e   :  { %v818_v46 = vadd.f32 %v810_v37, %v808_v34  ;;  %v812_v58 = vrot.slane %v811_v2, 4  ;;  %v466_v17 = vpop.f32.mrf.mxu0  ;;  %v825_v33 = vmul.f32 %v762_v43, %v1268_v7  ;;  %v797_v37 = vadd.f32 %v796_v9, %v795_v30 }
 0x12f   :  { %v764_v49 = vpop.f32.mrf.mxu1  ;;  %v519_v1 = vrot.slane %v518_v51, 2  ;;  %v526_v8 = vmul.f32 %v466_v17, %v1270_v22  ;;  %v527_v7 = vadd.f32 %v525_v5, %v523_v62  ;;  %v804_v39 = vadd.f32 %v803_v0, %v802_v60 }
 0x130   :  { %v819_v59 = vrot.slane %v818_v46, 4  ;;  %v826_v12 = vmul.f32 %v764_v49, %v1283_v28  ;;  %v813_v4 = vadd.f32 %v812_v58, %v811_v2  ;;  %v513_v28 = vadd.f32 %v512_v63, %v511_v50 }
 0x131   :  { %v766_v55 = vpop.f32.mrf.mxu1  ;;  %v534_v18 = vadd.f32 %v526_v8, %v524_v3  ;;  %v520_v20 = vadd.f32 %v519_v1, %v518_v51  ;;  %v528_v42 = vrot.slane %v527_v7, 4  ;;  %v798_v17 = vrot.slane %v797_v37, 1 }
 0x132   :  { %v827_v6 = vmul.f32 %v766_v55, %v1276_v16  ;;  %v820_v14 = vadd.f32 %v819_v59, %v818_v46  ;;  %v814_v27 = vrot.slane %v813_v4, 2  ;;  %v514_v40 = vrot.slane %v513_v28, 1 }
 0x133   :  { %v768_v61 = vpop.f32.mrf.mxu1  ;;  %v535_v21 = vrot.slane %v534_v18, 4  ;;  %v529_v31 = vadd.f32 %v528_v42, %v527_v7  ;;  %v521_v41 = vrot.slane %v520_v20, 1  ;;  %v497_v46 = vadd.f32 %v496_v26, %v495_v11 }
 0x134   :  { %v828_v10 = vmul.f32 %v768_v61, %v1280_v23  ;;  %v829_v15 = vadd.f32 %v827_v6, %v825_v33  ;;  %v503_v23 = vrot.slane %v502_v13, 1  ;;  %v821_v29 = vrot.slane %v820_v14, 2 }
 0x135   :  { %v536_v35 = vadd.f32 %v535_v21, %v534_v18  ;;  %v530_v43 = vrot.slane %v529_v31, 2  ;;  %v815_v32 = vadd.f32 %v814_v27, %v813_v4  ;;  %v515_v58 = vadd.f32 %v514_v40, %v513_v28 }
 0x136   :  { %v836_v19 = vadd.f32 %v828_v10, %v826_v12  ;;  %v830_v16 = vrot.slane %v829_v15, 4  ;;  %v504_v47 = vadd.f32 %v503_v23, %v502_v13  ;;  %v822_v48 = vadd.f32 %v821_v29, %v820_v14 }
 0x137   :  { %v537_v2 = vrot.slane %v536_v35, 2  ;;  %v531_v49 = vadd.f32 %v530_v43, %v529_v31  ;;  %v522_v59 = vadd.f32 %v521_v41, %v520_v20  ;;  %v805_v30 = vrot.slane %v804_v39, 1 }
 0x138   :  { %v837_v22 = vrot.slane %v836_v19, 4  ;;  %v831_v34 = vadd.f32 %v830_v16, %v829_v15  ;;  %v844_v33 = vsel %vm843_vm2, %v1308_v25, %v497_v46  ;;  %v845_v61 = vsel %vm843_vm2, %v486_v56, %v504_v47 }
 0x139   :  { %v538_v51 = vadd.f32 %v537_v2, %v536_v35  ;;  %v532_v60 = vrot.slane %v531_v49, 1  ;;  %v816_v63 = vrot.slane %v815_v32, 1  ;;  %v823_v1 = vrot.slane %v822_v48, 1 }
 0x13a   :  { %v838_v36 = vadd.f32 %v837_v22, %v836_v19  ;;  %v832_v44 = vrot.slane %v831_v34, 2  ;;  %v788_v53 = vadd.f32 %v787_v57, %v1312_v54  ;;  %v847_v8 = vsel %vm846_vm3, %v844_v33, %v515_v58 }
 0x13b   :  { %v539_v62 = vrot.slane %v538_v51, 1  ;;  %v533_v3 = vadd.f32 %v532_v60, %v531_v49  ;;  %v848_v10 = vsel %vm846_vm3, %v845_v61, %v522_v59  ;;  %v799_v11 = vadd.f32 %v798_v17, %v797_v37 }
 0x13c   :  { %v839_v45 = vrot.slane %v838_v36, 2  ;;  %v833_v50 = vadd.f32 %v832_v44, %v831_v34  ;;  %v806_v25 = vadd.f32 %v805_v30, %v804_v39  ;;  %v817_v14 = vadd.f32 %v816_v63, %v815_v32 }
 0x13d   :  { %v540_v5 = vadd.f32 %v539_v62, %v538_v51  ;;  %v850_v13 = vsel %vm849_vm4, %v847_v8, %v533_v3  ;;  %v824_v7 = vadd.f32 %v823_v1, %v822_v48 }
 0x13e   :  { %v840_v55 = vadd.f32 %v839_v45, %v838_v36  ;;  %v834_v12 = vrot.slane %v833_v50, 1  ;;  %v853_v15 = vsel %vm852_vm5, %v850_v13, %v781_v24 }
 0x13f   :  { %v851_v4 = vsel %vm849_vm4, %v848_v10, %v540_v5  ;;  %v856_v52 = vsel %vm855_vm6, %v853_v15, %v799_v11 }
 0x140   :  { %v841_v6 = vrot.slane %v840_v55, 1  ;;  %v854_v18 = vsel %vm852_vm5, %v851_v4, %v788_v53  ;;  %v835_v19 = vadd.f32 %v834_v12, %v833_v50  ;;  %v859_v9 = vsel %vm858_vm7, %v856_v52, %v817_v14 }
 0x141   :  { %v857_v54 = vsel %vm855_vm6, %v854_v18, %v806_v25 }
 0x142   :  { %v842_v38 = vadd.f32 %v841_v6, %v840_v55  ;;  %v860_v0 = vsel %vm858_vm7, %v857_v54, %v824_v7  ;;  %v862_v28 = vsel %vm861_vm8, %v859_v9, %v835_v19 }
 0x143   :  { %v864_v42 = vmax.f32 %v862_v28, 0.0 }
 0x144   :  { %v863_v20 = vsel %vm861_vm8, %v860_v0, %v842_v38 }
 0x145   :  { %v865_v16 = vmax.f32 %v863_v20, 0.0  ;;  %v866_v21 = vmin.f32 %v864_v42, 1.0 }
 0x147   :  { %v867_v22 = vmin.f32 %v865_v16, 1.0  ;;  %868 = vst [vmem:[#allocation9] sm:$0xff] %v866_v21 }
 0x149   :  { %869 = vst [vmem:[#allocation9 + $0x8] sm:$0xff] %v867_v22 }
 0x14a   :  { %1023 = shalt.err (!%p1020_p5)
}
 0x14b   :  { %879 = dma.vmem_to_hbm [thread:$0]  %s877_s25, 256, %s1353_s5, [#allocation4]  }
 0x14c   :  { %1036 = dma.done.wait [#allocation4], 256  }
 0x14d   :  { %1037 = vsyncadd [#allocation4], 4294967040 }
 0x14e   :  { %883 = vsyncpa [#allocation4], 1 }
 0x14f   :  { %884 = vsyncpa [#allocation5], 1 }
 0x150   :  { %885 = vsyncpa [#allocation7], 1 }

</bundles_post_ra>
